<compile_context>
chip_gen: v6e
topology: v6e:2x2x1
jax: 0.10.0
libtpu: 0.0.40
codegen_flags: <defaults>
</compile_context>

<pallas_src>
import warnings

import jax
import jax.numpy as jnp
from jax.experimental import pallas as pl
from jax.experimental.pallas import tpu as pltpu


def _patching_kernel(x_ref, o_ref, *, patch_len: int, stride: int,
                     num_patches: int):
    if stride == patch_len:
        # Non-overlapping patches: the output row is just the contiguous
        # prefix of the input row (unfold drops the trailing leftover).
        o_ref[...] = x_ref[:, pl.ds(0, num_patches * patch_len)]
    elif patch_len % 128 == 0 and stride % 128 == 0:
        # Lane-aligned patches: every per-patch store is already an
        # unmasked, lane-dense vst -- copy patch by patch.
        for n in range(num_patches):
            o_ref[:, pl.ds(n * patch_len, patch_len)] = (
                x_ref[:, pl.ds(n * stride, patch_len)])
    else:
        # General overlapping / gapped case: gather all patches into vregs,
        # concatenate along lanes (XLU work, off the store slot) and issue a
        # single wide, unmasked store covering the whole output row block.
        pieces = [x_ref[:, pl.ds(n * stride, patch_len)]
                  for n in range(num_patches)]
        o_ref[...] = jnp.concatenate(pieces, axis=-1)


def _choose_rows_tile(rows: int, bytes_per_row: int) -> int:
    # Keep each (in + out) block <= ~8 MiB so double-buffering stays far below
    # the scoped-VMEM default on every generation (incl. v7x's 64 MiB VMEM).
    budget = 8 * 1024 * 1024
    # Prefer >= 2 sublane-aligned row blocks (v7x megacore) with big tiles.
    for t in (1024, 512, 256, 128, 64, 32, 16, 8):
        if rows % t == 0 and rows // t >= 2 and t * bytes_per_row <= budget:
            return t
    # Otherwise any sublane-aligned divisor within budget.
    for t in (1024, 512, 256, 128, 64, 32, 16, 8):
        if rows % t == 0 and t * bytes_per_row <= budget:
            return t
    # Single full-array block (exempt from the (8,128) divisibility rule).
    return rows


def patching_forward(x: jax.Array, patch_len: int, stride: int) -> jax.Array:
    """Pallas equivalent of Patching(patch_len, stride).forward(x)."""
    *lead, L = x.shape
    if L < patch_len:
        raise ValueError(f"seq_len={L} is shorter than patch_len={patch_len}")
    num_patches = (L - patch_len) // stride + 1
    out_cols = num_patches * patch_len

    rows = 1
    for d in lead:
        rows *= d
    x2d = x.reshape(rows, L)

    bytes_per_row = (L + out_cols) * x.dtype.itemsize
    rows_tile = _choose_rows_tile(rows, bytes_per_row)
    grid = (rows // rows_tile,)

    # If we had to fall back to one full-array block, make sure the scoped
    # VMEM limit can hold it (with a little headroom for double-buffering).
    block_bytes = 2 * rows_tile * bytes_per_row
    vmem_limit = None
    if block_bytes > 24 * 1024 * 1024:
        vmem_limit = min(block_bytes + (8 << 20), 56 * 1024 * 1024)

    kernel = lambda x_ref, o_ref: _patching_kernel(
        x_ref, o_ref, patch_len=patch_len, stride=stride,
        num_patches=num_patches)

    out2d = pl.pallas_call(
        kernel,
        out_shape=jax.ShapeDtypeStruct((rows, out_cols), x.dtype),
        grid=grid,
        in_specs=[pl.BlockSpec((rows_tile, L), lambda r: (r, 0))],
        out_specs=pl.BlockSpec((rows_tile, out_cols), lambda r: (r, 0)),
        compiler_params=pltpu.CompilerParams(
            dimension_semantics=("parallel",),
            vmem_limit_bytes=vmem_limit),
    )(x2d)

    return out2d.reshape(*lead, num_patches, patch_len)


class Patching:
    """Mirror of the torch module: init-time warning + Pallas forward."""

    def __init__(self, patch_len: int, stride: int):
        self.patch_len = patch_len
        self.stride = stride
        if self.stride != self.patch_len:
            warnings.warn("Stride and patch length are not equal. "
                          "This may lead to unexpected behavior.")

    def __call__(self, x: jax.Array) -> jax.Array:
        return patching_forward(x, self.patch_len, self.stride)


def _reference_unfold(x, patch_len, stride):
    """Pure-JAX reference for torch.Tensor.unfold on the last dim."""
    L = x.shape[-1]
    n = (L - patch_len) // stride + 1
    patches = [
        jax.lax.slice_in_dim(x, k * stride, k * stride + patch_len, axis=-1)
        for k in range(n)
    ]
    return jnp.stack(patches, axis=-2)


if __name__ == "__main__":
    key = jax.random.PRNGKey(0)
    # MOMENT usage: x is (batch, n_channels, seq_len); patch_len == stride == 8.
    x = jax.random.normal(key, (2, 4, 64), dtype=jnp.float32)

    # Normal MOMENT configuration (non-overlapping patches).
    mod = Patching(patch_len=8, stride=8)
    out = jax.block_until_ready(mod(x))
    ref = _reference_unfold(x, 8, 8)
    assert out.shape == (2, 4, 8, 8), out.shape
    assert jnp.array_equal(out, ref), "mismatch vs reference (stride == patch_len)"

    # Overlapping patches exercise the general unfold path (lane-gather + one
    # dense store).
    with warnings.catch_warnings():
        warnings.simplefilter("ignore")
        mod2 = Patching(patch_len=16, stride=8)
    out2 = jax.block_until_ready(mod2(x))
    ref2 = _reference_unfold(x, 16, 8)
    assert out2.shape == (2, 4, 7, 16), out2.shape
    assert jnp.array_equal(out2, ref2), "mismatch vs reference (stride != patch_len)"

    # Larger, sublane-tiled case to exercise the multi-block grid path.
    x3 = jax.random.normal(key, (8, 8, 128), dtype=jnp.float32)
    out3 = jax.block_until_ready(patching_forward(x3, 8, 8))
    ref3 = _reference_unfold(x3, 8, 8)
    assert out3.shape == (8, 8, 16, 8), out3.shape
    assert jnp.array_equal(out3, ref3), "mismatch vs reference (multi-block)"

    print("KERNEL_OK")
</pallas_src>

<mosaic_0001>
module attributes {stable_mosaic.version = 11 : i64} {
  func.func @_lambda_(%arg0: i32, %arg1: memref<8x64xf32, #tpu.memory_space<vmem>>, %arg2: memref<8x64xf32, #tpu.memory_space<vmem>>) attributes {dimension_semantics = [#tpu.dimension_semantics<parallel>], iteration_bounds = array<i64: 1>, scalar_prefetch = 0 : i64, scratch_operands = 0 : i64, tpu.core_type = #tpu.core_type<tc>, window_params = [{transform_indices = @transform_0, window_bounds = array<i64: 8, 64>}, {transform_indices = @transform_1, window_bounds = array<i64: 8, 64>}]} {
    %c0 = arith.constant 0 : index
    %c0_0 = arith.constant 0 : index
    %0 = vector.load %arg1[%c0, %c0_0] : memref<8x64xf32, #tpu.memory_space<vmem>>, vector<8x64xf32>
    %c0_1 = arith.constant 0 : index
    %c0_2 = arith.constant 0 : index
    %1 = vector.load %arg2[%c0_1, %c0_2] : memref<8x64xf32, #tpu.memory_space<vmem>>, vector<8x64xf32>
    tpu.vector_store %arg2[%c0_1, %c0_2], %0 {strides = array<i32>} : memref<8x64xf32, #tpu.memory_space<vmem>>, vector<8x64xf32>,
    return
  }
  func.func @transform_0(%arg0: i32) -> (i32, i32) {
    %c0_i32 = arith.constant 0 : i32
    %c0_i32_0 = arith.constant 0 : i32
    return %arg0, %c0_i32 : i32, i32
  }
  func.func @transform_1(%arg0: i32) -> (i32, i32) {
    %c0_i32 = arith.constant 0 : i32
    %c0_i32_0 = arith.constant 0 : i32
    return %arg0, %c0_i32 : i32, i32
  }
}

</mosaic_0001>

<bundles_post_ra>
// kernel: tpu_custom_call.1
= control target key start
LH: loop header
LB: loop body
LE: loop exit
PB: predicated region body
PF: predicated region fallthrough
CT: control target
= control target key end

     0   :  { %6 = vsyncpa [#allocation3], 0  ;;  %s103_s0 = inlined_call_operand.hbm [shape: f32[8,64], index: 0, kind: input, shape index: {}]   ;;  %s104_s1 = inlined_call_operand.hbm [shape: f32[8,64], index: 1, kind: output, shape index: {}]  }
   0x1   :  { %7 = vsyncpa [#allocation4], 0  ;;  %s85_s6 = smov [#allocation2]  }
   0x2   :  { %s14_s7 = sshll.u32 %s85_s6, 4  ;;  %s15_s7 = int_to_ptr.vmem [resolvable:$true] %s14_s7 }
   0x3   :  { %s49_s8 = scalar_lea.vmem %s15_s7, 128  ;;  %p54_p1 = scmp.lt.s32.totalorder %s15_s7, %s15_s7 }
   0x4   :  { %p50_p0 = scmp.ne.s32.totalorder %s15_s7, %s49_s8  ;;  %p55_p2 = scmp.lt.s32.totalorder %s49_s8, %s49_s8 }
   0x6   :  { %p56_p3 = por %p55_p2, %p54_p1 }
   0x8   :  { %p57_p4 = pnand %p56_p3, %p50_p0 }
   0xa   :  { %60 = shalt.err (!%p57_p4)
}
   0xb   :  { %17 = dma.hbm_to_vmem [thread:$0]  %s103_s0, 128, %s15_s7, [#allocation3]  }
   0xc   :  { %81 = dma.done.wait [#allocation3], 128  }
   0xd   :  { %82 = vsyncadd [#allocation3], 4294967168  ;;  %s86_s11 = smov [#allocation5]   ;;  %vm22_vm0 = vcmask 523264   ;;  %v21_v0 = vld [vmem:[#allocation2] sm:$0xff] }
   0xe   :  { %s30_s12 = sshll.u32 %s86_s11, 4  ;;  %23 = vst.msk [vmem:[#allocation5] sm:$0xff] %vm22_vm0, %v21_v0  ;;  %s31_s12 = int_to_ptr.vmem [resolvable:$true] %s30_s12 }
   0xf   :  { %s61_s13 = scalar_lea.vmem %s31_s12, 128  ;;  %p66_p6 = scmp.lt.s32.totalorder %s31_s12, %s31_s12 }
  0x10   :  { %p62_p5 = scmp.ne.s32.totalorder %s31_s12, %s61_s13  ;;  %p67_p7 = scmp.lt.s32.totalorder %s61_s13, %s61_s13 }
  0x12   :  { %p68_p8 = por %p67_p7, %p66_p6 }
  0x14   :  { %p69_p9 = pnand %p68_p8, %p62_p5 }
  0x16   :  { %72 = shalt.err (!%p69_p9)
}
  0x17   :  { %33 = dma.vmem_to_hbm [thread:$0]  %s31_s12, 128, %s104_s1, [#allocation4]  }
  0x18   :  { %83 = dma.done.wait [#allocation4], 128  }
  0x19   :  { %84 = vsyncadd [#allocation4], 4294967168 }
  0x1a   :  { %37 = vsyncpa [#allocation3], 1 }
  0x1b   :  { %38 = vsyncpa [#allocation4], 1 }

</bundles_post_ra>
